<compile_context>
chip_gen: v5e
topology: v5e:2x2
jax: 0.10.0
libtpu: 0.0.40
codegen_flags: <defaults>
</compile_context>

<pallas_src>
import jax
import jax.numpy as jnp
from jax.experimental import pallas as pl
from jax.experimental.pallas import tpu as pltpu


# ----------------------------- Pallas kernel -------------------------------- #

def crop_res_block_kernel(x_ref, t1_ref, s1_ref, b1_ref,
                          t2_ref, s2_ref, b2_ref,
                          td_ref, sd_ref, bd_ref, o_ref):
    """Fused CropResBlock for one image.

    x_ref : (H, W*Cin)            bf16  channels-last row slab
    t1_ref: (3, W*Cin,  W1*Cout)  bf16  conv1 block-Toeplitz weights (per kh)
    t2_ref: (3, W1*Cout, W2*Cout) f32   conv2 block-Toeplitz weights (per kh)
    td_ref: (W*Cin, W2*Cout)      bf16  crop(+2,+2) + 1x1 downsample weights
    s*/b* : (1, width)            f32   folded BatchNorm scale / bias (tiled over W)
    o_ref : (H2, W2*Cout)         f32
    """
    H = x_ref.shape[0]
    H1, H2 = H - 2, H - 4

    def dot32(a, b):
        return jnp.dot(a, b, preferred_element_type=jnp.float32)

    x = x_ref[...]                                               # (H, W*Cin) bf16

    # conv1 (3x3 VALID): full-height matmuls per kh, then row-shifted combine.
    z0 = dot32(x, t1_ref[0])
    z1 = dot32(x, t1_ref[1])
    z2 = dot32(x, t1_ref[2])
    acc1 = z0[0:H1, :] + z1[1:1 + H1, :] + z2[2:2 + H1, :]       # (H1, W1*Cout)
    y1 = jnp.maximum(acc1 * s1_ref[...] + b1_ref[...], 0.0)      # bn1 + relu (f32)

    # conv2 (3x3 VALID) on the VMEM-resident y1.
    u0 = dot32(y1, t2_ref[0])
    u1 = dot32(y1, t2_ref[1])
    u2 = dot32(y1, t2_ref[2])
    main = u0[0:H2, :] + u1[1:1 + H2, :] + u2[2:2 + H2, :]       # (H2, W2*Cout)
    main = main * s2_ref[...] + b2_ref[...]                      # bn2

    # identity: ZeroPad2d(-2) crop + 1x1 conv + BN from the same x slab.
    iden = dot32(x, td_ref[...])[2:2 + H2, :]
    iden = iden * sd_ref[...] + bd_ref[...]

    o_ref[...] = jnp.maximum(main + iden, 0.0).astype(o_ref.dtype)


# ------------------------------- JAX glue ------------------------------------ #

def fold_bn(gamma, beta, mean, var, eps=1e-5):
    scale = gamma / jnp.sqrt(var + eps)
    bias = beta - mean * scale
    return scale.astype(jnp.float32), bias.astype(jnp.float32)


def row_toeplitz(w_oihw, width):
    """Expand OIHW conv weights so conv-along-W becomes a plain matmul.

    Returns T with shape (KH, width*Cin, Wo*Cout), Wo = width - KW + 1, with
      T[kh, wi*Cin + ci, wo*Cout + co] = w[co, ci, kh, wi - wo]   (0 <= wi-wo < KW)
    so that for a channels-last row slab x2d[h, wi*Cin + ci]:
      y2d[h] = sum_kh  x2d[h + kh] @ T[kh].
    """
    Cout, Cin, KH, KW = w_oihw.shape
    Wo = width - KW + 1
    w_t = jnp.transpose(w_oihw, (2, 3, 1, 0))               # (KH, KW, Cin, Cout)
    wi = jnp.arange(width)[:, None]
    wo = jnp.arange(Wo)[None, :]
    kw = wi - wo                                            # (width, Wo)
    valid = (kw >= 0) & (kw < KW)
    T = w_t[:, jnp.clip(kw, 0, KW - 1), :, :]               # (KH, width, Wo, Cin, Cout)
    T = jnp.where(valid[None, :, :, None, None], T, 0.0)
    T = jnp.transpose(T, (0, 1, 3, 2, 4))                   # (KH, width, Cin, Wo, Cout)
    return T.reshape(KH, width * Cin, Wo * Cout)


@jax.jit
def crop_res_block(x_nchw, p):
    """CropResBlock forward: padding=0, groups=1, inference-mode BN."""
    N, Cin, H, W = x_nchw.shape
    Cout = p["w1"].shape[0]
    H1, W1 = H - 2, W - 2
    H2, W2 = H - 4, W - 4

    # NCHW -> channels-last row slab (N, H, W*Cin); bf16 halves HBM bytes streamed.
    x = jnp.transpose(x_nchw, (0, 2, 3, 1)).reshape(N, H, W * Cin)
    x = x.astype(jnp.bfloat16)

    s1, b1 = fold_bn(p["g1"], p["be1"], p["rm1"], p["rv1"])
    s2, b2 = fold_bn(p["g2"], p["be2"], p["rm2"], p["rv2"])
    sd, bd = fold_bn(p["gd"], p["bed"], p["rmd"], p["rvd"])

    # Block-Toeplitz weight expansion (tiny; conv along W folded into the matmul).
    t1 = row_toeplitz(p["w1"], W).astype(jnp.bfloat16)       # (3, W*Cin,  W1*Cout)
    t2 = row_toeplitz(p["w2"], W1).astype(jnp.float32)       # (3, W1*Cout, W2*Cout)
    wd = p["wd"][:, :, 0, 0]                                 # (Cout, Cin)
    wd_fake = jnp.zeros((Cout, Cin, 1, 5), jnp.float32).at[:, :, 0, 2].set(wd)
    td = row_toeplitz(wd_fake, W)[0].astype(jnp.bfloat16)    # (W*Cin, W2*Cout)

    # Per-output-column (wo*Cout + co) BN affines.
    s1r, b1r = jnp.tile(s1, W1)[None, :], jnp.tile(b1, W1)[None, :]
    s2r, b2r = jnp.tile(s2, W2)[None, :], jnp.tile(b2, W2)[None, :]
    sdr, bdr = jnp.tile(sd, W2)[None, :], jnp.tile(bd, W2)[None, :]

    def full(shape):
        return pl.BlockSpec(shape, lambda n: tuple(0 for _ in shape))

    out2d = pl.pallas_call(
        crop_res_block_kernel,
        out_shape=jax.ShapeDtypeStruct((N, H2, W2 * Cout), jnp.float32),
        grid=(N,),
        in_specs=[
            pl.BlockSpec((None, H, W * Cin), lambda n: (n, 0, 0)),
            full(t1.shape), full(s1r.shape), full(b1r.shape),
            full(t2.shape), full(s2r.shape), full(b2r.shape),
            full(td.shape), full(sdr.shape), full(bdr.shape),
        ],
        out_specs=pl.BlockSpec((None, H2, W2 * Cout), lambda n: (n, 0, 0)),
        compiler_params=pltpu.CompilerParams(
            dimension_semantics=("parallel",),      # shards batch across v7x's 2 TCs
            vmem_limit_bytes=32 * 1024 * 1024,
        ),
    )(x, t1, s1r, b1r, t2, s2r, b2r, td, sdr, bdr)

    out = out2d.reshape(N, H2, W2, Cout)
    return jnp.transpose(out, (0, 3, 1, 2))                  # back to NCHW


# ----------------------------- plain-JAX reference --------------------------- #

def _conv2d_nchw(x, w):
    return jax.lax.conv_general_dilated(
        x, w, (1, 1), "VALID", dimension_numbers=("NCHW", "OIHW", "NCHW"))


def ref_forward(x, p):
    s1, b1 = fold_bn(p["g1"], p["be1"], p["rm1"], p["rv1"])
    s2, b2 = fold_bn(p["g2"], p["be2"], p["rm2"], p["rv2"])
    sd, bd = fold_bn(p["gd"], p["bed"], p["rmd"], p["rvd"])
    y = _conv2d_nchw(x, p["w1"])
    y = y * s1[None, :, None, None] + b1[None, :, None, None]
    y = jnp.maximum(y, 0.0)
    y = _conv2d_nchw(y, p["w2"])
    y = y * s2[None, :, None, None] + b2[None, :, None, None]
    iden = x[:, :, 2:-2, 2:-2]
    iden = _conv2d_nchw(iden, p["wd"])
    iden = iden * sd[None, :, None, None] + bd[None, :, None, None]
    return jnp.maximum(y + iden, 0.0)


# --------------------------------- main --------------------------------------- #

if __name__ == "__main__":
    N, Cin, Cout, H, W = 2, 4, 8, 16, 16
    key = jax.random.PRNGKey(0)
    k_x, k_w1, k_w2, k_wd = jax.random.split(key, 4)

    x = jax.random.normal(k_x, (N, Cin, H, W), jnp.float32)

    def bn_params(c, base):
        i = jnp.arange(c, dtype=jnp.float32)
        return dict(
            g=1.0 + 0.01 * (i + base),
            be=0.02 * (i - base),
            rm=0.03 * (i + 0.5 * base),
            rv=1.0 + 0.05 * (i + base),
        )

    bn1, bn2, bnd = bn_params(Cout, 1.0), bn_params(Cout, 2.0), bn_params(Cout, 3.0)
    params = {
        "w1": 0.1 * jax.random.normal(k_w1, (Cout, Cin, 3, 3), jnp.float32),
        "w2": 0.1 * jax.random.normal(k_w2, (Cout, Cout, 3, 3), jnp.float32),
        "wd": 0.1 * jax.random.normal(k_wd, (Cout, Cin, 1, 1), jnp.float32),
        "g1": bn1["g"], "be1": bn1["be"], "rm1": bn1["rm"], "rv1": bn1["rv"],
        "g2": bn2["g"], "be2": bn2["be"], "rm2": bn2["rm"], "rv2": bn2["rv"],
        "gd": bnd["g"], "bed": bnd["be"], "rmd": bnd["rm"], "rvd": bnd["rv"],
    }

    out = crop_res_block(x, params)
    out = jax.block_until_ready(out)

    assert out.shape == (N, Cout, H - 4, W - 4), out.shape

    ref = jax.block_until_ready(ref_forward(x, params))
    err = float(jnp.max(jnp.abs(out - ref)))
    # bf16 streaming of the activation and conv1/downsample weights => ~1e-2-level
    # deviation from the pure-f32 reference is expected.
    assert jnp.allclose(out, ref, atol=2e-2, rtol=2e-2), f"max abs err {err}"

    print("KERNEL_OK")
</pallas_src>

<mosaic_0001>
module attributes {stable_mosaic.version = 11 : i64} {
  func.func @crop_res_block_kernel(%arg0: i32, %arg1: memref<1x16x64xbf16, #tpu.memory_space<vmem>>, %arg2: memref<3x64x112xbf16, #tpu.memory_space<vmem>>, %arg3: memref<1x112xf32, #tpu.memory_space<vmem>>, %arg4: memref<1x112xf32, #tpu.memory_space<vmem>>, %arg5: memref<3x112x96xf32, #tpu.memory_space<vmem>>, %arg6: memref<1x96xf32, #tpu.memory_space<vmem>>, %arg7: memref<1x96xf32, #tpu.memory_space<vmem>>, %arg8: memref<64x96xbf16, #tpu.memory_space<vmem>>, %arg9: memref<1x96xf32, #tpu.memory_space<vmem>>, %arg10: memref<1x96xf32, #tpu.memory_space<vmem>>, %arg11: memref<1x12x96xf32, #tpu.memory_space<vmem>>) attributes {dimension_semantics = [#tpu.dimension_semantics<parallel>], iteration_bounds = array<i64: 2>, scalar_prefetch = 0 : i64, scratch_operands = 0 : i64, tpu.core_type = #tpu.core_type<tc>, window_params = [{transform_indices = @transform_0, window_bounds = array<i64: 1, 16, 64>}, {pipeline_mode = #tpu.pipeline_mode<synchronous>, transform_indices = @transform_1, window_bounds = array<i64: 3, 64, 112>}, {pipeline_mode = #tpu.pipeline_mode<synchronous>, transform_indices = @transform_2, window_bounds = array<i64: 1, 112>}, {pipeline_mode = #tpu.pipeline_mode<synchronous>, transform_indices = @transform_3, window_bounds = array<i64: 1, 112>}, {pipeline_mode = #tpu.pipeline_mode<synchronous>, transform_indices = @transform_4, window_bounds = array<i64: 3, 112, 96>}, {pipeline_mode = #tpu.pipeline_mode<synchronous>, transform_indices = @transform_5, window_bounds = array<i64: 1, 96>}, {pipeline_mode = #tpu.pipeline_mode<synchronous>, transform_indices = @transform_6, window_bounds = array<i64: 1, 96>}, {pipeline_mode = #tpu.pipeline_mode<synchronous>, transform_indices = @transform_7, window_bounds = array<i64: 64, 96>}, {pipeline_mode = #tpu.pipeline_mode<synchronous>, transform_indices = @transform_8, window_bounds = array<i64: 1, 96>}, {pipeline_mode = #tpu.pipeline_mode<synchronous>, transform_indices = @transform_9, window_bounds = array<i64: 1, 96>}, {transform_indices = @transform_10, window_bounds = array<i64: 1, 12, 96>}]} {
    %c0 = arith.constant 0 : index
    %c0_0 = arith.constant 0 : index
    %c0_1 = arith.constant 0 : index
    %0 = vector.load %arg1[%c0, %c0_0, %c0_1] : memref<1x16x64xbf16, #tpu.memory_space<vmem>>, vector<1x16x64xbf16>
    %1 = vector.shape_cast %0 : vector<1x16x64xbf16> to vector<16x64xbf16>
    %c0_2 = arith.constant 0 : index
    %c0_3 = arith.constant 0 : index
    %c0_4 = arith.constant 0 : index
    %2 = vector.load %arg2[%c0_2, %c0_3, %c0_4] : memref<3x64x112xbf16, #tpu.memory_space<vmem>>, vector<1x64x112xbf16>
    %3 = vector.shape_cast %2 : vector<1x64x112xbf16> to vector<64x112xbf16>
    %cst = arith.constant dense<0.000000e+00> : vector<16x112xf32>
    %4 = tpu.matmul %1, %3, %cst {dimension_numbers = #tpu.dot_dimension_numbers<[1], [0], [0], [1], [0, 0, 1, 1], [], []>} : vector<16x64xbf16>, vector<64x112xbf16>, vector<16x112xf32> -> vector<16x112xf32>
    %c1 = arith.constant 1 : index
    %c0_5 = arith.constant 0 : index
    %c0_6 = arith.constant 0 : index
    %5 = vector.load %arg2[%c1, %c0_5, %c0_6] : memref<3x64x112xbf16, #tpu.memory_space<vmem>>, vector<1x64x112xbf16>
    %6 = vector.shape_cast %5 : vector<1x64x112xbf16> to vector<64x112xbf16>
    %cst_7 = arith.constant dense<0.000000e+00> : vector<16x112xf32>
    %7 = tpu.matmul %1, %6, %cst_7 {dimension_numbers = #tpu.dot_dimension_numbers<[1], [0], [0], [1], [0, 0, 1, 1], [], []>} : vector<16x64xbf16>, vector<64x112xbf16>, vector<16x112xf32> -> vector<16x112xf32>
    %c2 = arith.constant 2 : index
    %c0_8 = arith.constant 0 : index
    %c0_9 = arith.constant 0 : index
    %8 = vector.load %arg2[%c2, %c0_8, %c0_9] : memref<3x64x112xbf16, #tpu.memory_space<vmem>>, vector<1x64x112xbf16>
    %9 = vector.shape_cast %8 : vector<1x64x112xbf16> to vector<64x112xbf16>
    %cst_10 = arith.constant dense<0.000000e+00> : vector<16x112xf32>
    %10 = tpu.matmul %1, %9, %cst_10 {dimension_numbers = #tpu.dot_dimension_numbers<[1], [0], [0], [1], [0, 0, 1, 1], [], []>} : vector<16x64xbf16>, vector<64x112xbf16>, vector<16x112xf32> -> vector<16x112xf32>
    %11 = vector.extract_strided_slice %4 {offsets = [0, 0], sizes = [14, 112], strides = [1, 1]} : vector<16x112xf32> to vector<14x112xf32>
    %12 = vector.extract_strided_slice %7 {offsets = [1, 0], sizes = [14, 112], strides = [1, 1]} : vector<16x112xf32> to vector<14x112xf32>
    %13 = arith.addf %11, %12 : vector<14x112xf32>
    %14 = vector.extract_strided_slice %10 {offsets = [2, 0], sizes = [14, 112], strides = [1, 1]} : vector<16x112xf32> to vector<14x112xf32>
    %15 = arith.addf %13, %14 : vector<14x112xf32>
    %c0_11 = arith.constant 0 : index
    %c0_12 = arith.constant 0 : index
    %16 = vector.load %arg3[%c0_11, %c0_12] : memref<1x112xf32, #tpu.memory_space<vmem>>, vector<1x112xf32>
    %17 = vector.broadcast %16 : vector<1x112xf32> to vector<14x112xf32>
    %18 = arith.mulf %15, %17 : vector<14x112xf32>
    %c0_13 = arith.constant 0 : index
    %c0_14 = arith.constant 0 : index
    %19 = vector.load %arg4[%c0_13, %c0_14] : memref<1x112xf32, #tpu.memory_space<vmem>>, vector<1x112xf32>
    %20 = vector.broadcast %19 : vector<1x112xf32> to vector<14x112xf32>
    %21 = arith.addf %18, %20 : vector<14x112xf32>
    %cst_15 = arith.constant 0.000000e+00 : f32
    %22 = vector.broadcast %cst_15 : f32 to vector<14x112xf32>
    %23 = arith.maximumf %21, %22 : vector<14x112xf32>
    %c0_16 = arith.constant 0 : index
    %c0_17 = arith.constant 0 : index
    %c0_18 = arith.constant 0 : index
    %24 = vector.load %arg5[%c0_16, %c0_17, %c0_18] : memref<3x112x96xf32, #tpu.memory_space<vmem>>, vector<1x112x96xf32>
    %25 = vector.shape_cast %24 : vector<1x112x96xf32> to vector<112x96xf32>
    %cst_19 = arith.constant dense<0.000000e+00> : vector<14x96xf32>
    %26 = tpu.matmul %23, %25, %cst_19 {dimension_numbers = #tpu.dot_dimension_numbers<[1], [0], [0], [1], [0, 0, 1, 1], [], []>} : vector<14x112xf32>, vector<112x96xf32>, vector<14x96xf32> -> vector<14x96xf32>
    %c1_20 = arith.constant 1 : index
    %c0_21 = arith.constant 0 : index
    %c0_22 = arith.constant 0 : index
    %27 = vector.load %arg5[%c1_20, %c0_21, %c0_22] : memref<3x112x96xf32, #tpu.memory_space<vmem>>, vector<1x112x96xf32>
    %28 = vector.shape_cast %27 : vector<1x112x96xf32> to vector<112x96xf32>
    %cst_23 = arith.constant dense<0.000000e+00> : vector<14x96xf32>
    %29 = tpu.matmul %23, %28, %cst_23 {dimension_numbers = #tpu.dot_dimension_numbers<[1], [0], [0], [1], [0, 0, 1, 1], [], []>} : vector<14x112xf32>, vector<112x96xf32>, vector<14x96xf32> -> vector<14x96xf32>
    %c2_24 = arith.constant 2 : index
    %c0_25 = arith.constant 0 : index
    %c0_26 = arith.constant 0 : index
    %30 = vector.load %arg5[%c2_24, %c0_25, %c0_26] : memref<3x112x96xf32, #tpu.memory_space<vmem>>, vector<1x112x96xf32>
    %31 = vector.shape_cast %30 : vector<1x112x96xf32> to vector<112x96xf32>
    %cst_27 = arith.constant dense<0.000000e+00> : vector<14x96xf32>
    %32 = tpu.matmul %23, %31, %cst_27 {dimension_numbers = #tpu.dot_dimension_numbers<[1], [0], [0], [1], [0, 0, 1, 1], [], []>} : vector<14x112xf32>, vector<112x96xf32>, vector<14x96xf32> -> vector<14x96xf32>
    %33 = vector.extract_strided_slice %26 {offsets = [0, 0], sizes = [12, 96], strides = [1, 1]} : vector<14x96xf32> to vector<12x96xf32>
    %34 = vector.extract_strided_slice %29 {offsets = [1, 0], sizes = [12, 96], strides = [1, 1]} : vector<14x96xf32> to vector<12x96xf32>
    %35 = arith.addf %33, %34 : vector<12x96xf32>
    %36 = vector.extract_strided_slice %32 {offsets = [2, 0], sizes = [12, 96], strides = [1, 1]} : vector<14x96xf32> to vector<12x96xf32>
    %37 = arith.addf %35, %36 : vector<12x96xf32>
    %c0_28 = arith.constant 0 : index
    %c0_29 = arith.constant 0 : index
    %38 = vector.load %arg6[%c0_28, %c0_29] : memref<1x96xf32, #tpu.memory_space<vmem>>, vector<1x96xf32>
    %39 = vector.broadcast %38 : vector<1x96xf32> to vector<12x96xf32>
    %40 = arith.mulf %37, %39 : vector<12x96xf32>
    %c0_30 = arith.constant 0 : index
    %c0_31 = arith.constant 0 : index
    %41 = vector.load %arg7[%c0_30, %c0_31] : memref<1x96xf32, #tpu.memory_space<vmem>>, vector<1x96xf32>
    %42 = vector.broadcast %41 : vector<1x96xf32> to vector<12x96xf32>
    %43 = arith.addf %40, %42 : vector<12x96xf32>
    %c0_32 = arith.constant 0 : index
    %c0_33 = arith.constant 0 : index
    %44 = vector.load %arg8[%c0_32, %c0_33] : memref<64x96xbf16, #tpu.memory_space<vmem>>, vector<64x96xbf16>
    %cst_34 = arith.constant dense<0.000000e+00> : vector<16x96xf32>
    %45 = tpu.matmul %1, %44, %cst_34 {dimension_numbers = #tpu.dot_dimension_numbers<[1], [0], [0], [1], [0, 0, 1, 1], [], []>} : vector<16x64xbf16>, vector<64x96xbf16>, vector<16x96xf32> -> vector<16x96xf32>
    %46 = vector.extract_strided_slice %45 {offsets = [2, 0], sizes = [12, 96], strides = [1, 1]} : vector<16x96xf32> to vector<12x96xf32>
    %c0_35 = arith.constant 0 : index
    %c0_36 = arith.constant 0 : index
    %47 = vector.load %arg9[%c0_35, %c0_36] : memref<1x96xf32, #tpu.memory_space<vmem>>, vector<1x96xf32>
    %48 = vector.broadcast %47 : vector<1x96xf32> to vector<12x96xf32>
    %49 = arith.mulf %46, %48 : vector<12x96xf32>
    %c0_37 = arith.constant 0 : index
    %c0_38 = arith.constant 0 : index
    %50 = vector.load %arg10[%c0_37, %c0_38] : memref<1x96xf32, #tpu.memory_space<vmem>>, vector<1x96xf32>
    %51 = vector.broadcast %50 : vector<1x96xf32> to vector<12x96xf32>
    %52 = arith.addf %49, %51 : vector<12x96xf32>
    %53 = arith.addf %43, %52 : vector<12x96xf32>
    %cst_39 = arith.constant 0.000000e+00 : f32
    %54 = vector.broadcast %cst_39 : f32 to vector<12x96xf32>
    %55 = arith.maximumf %53, %54 : vector<12x96xf32>
    %c0_40 = arith.constant 0 : index
    %c0_41 = arith.constant 0 : index
    %c0_42 = arith.constant 0 : index
    %56 = vector.load %arg11[%c0_40, %c0_41, %c0_42] : memref<1x12x96xf32, #tpu.memory_space<vmem>>, vector<1x12x96xf32>
    %57 = vector.shape_cast %56 : vector<1x12x96xf32> to vector<12x96xf32>
    %58 = vector.shape_cast %55 : vector<12x96xf32> to vector<1x12x96xf32>
    tpu.vector_store %arg11[%c0_40, %c0_41, %c0_42], %58 {strides = array<i32>} : memref<1x12x96xf32, #tpu.memory_space<vmem>>, vector<1x12x96xf32>,
    return
  }
  func.func @transform_0(%arg0: i32) -> (i32, i32, i32) {
    %c0_i32 = arith.constant 0 : i32
    %c0_i32_0 = arith.constant 0 : i32
    %c0_i32_1 = arith.constant 0 : i32
    return %arg0, %c0_i32, %c0_i32_0 : i32, i32, i32
  }
  func.func @transform_1(%arg0: i32) -> (i32, i32, i32) {
    %c0_i32 = arith.constant 0 : i32
    %c0_i32_0 = arith.constant 0 : i32
    %c0_i32_1 = arith.constant 0 : i32
    %c0_i32_2 = arith.constant 0 : i32
    return %c0_i32, %c0_i32_0, %c0_i32_1 : i32, i32, i32
  }
  func.func @transform_2(%arg0: i32) -> (i32, i32) {
    %c0_i32 = arith.constant 0 : i32
    %c0_i32_0 = arith.constant 0 : i32
    %c0_i32_1 = arith.constant 0 : i32
    return %c0_i32, %c0_i32_0 : i32, i32
  }
  func.func @transform_3(%arg0: i32) -> (i32, i32) {
    %c0_i32 = arith.constant 0 : i32
    %c0_i32_0 = arith.constant 0 : i32
    %c0_i32_1 = arith.constant 0 : i32
    return %c0_i32, %c0_i32_0 : i32, i32
  }
  func.func @transform_4(%arg0: i32) -> (i32, i32, i32) {
    %c0_i32 = arith.constant 0 : i32
    %c0_i32_0 = arith.constant 0 : i32
    %c0_i32_1 = arith.constant 0 : i32
    %c0_i32_2 = arith.constant 0 : i32
    return %c0_i32, %c0_i32_0, %c0_i32_1 : i32, i32, i32
  }
  func.func @transform_5(%arg0: i32) -> (i32, i32) {
    %c0_i32 = arith.constant 0 : i32
    %c0_i32_0 = arith.constant 0 : i32
    %c0_i32_1 = arith.constant 0 : i32
    return %c0_i32, %c0_i32_0 : i32, i32
  }
  func.func @transform_6(%arg0: i32) -> (i32, i32) {
    %c0_i32 = arith.constant 0 : i32
    %c0_i32_0 = arith.constant 0 : i32
    %c0_i32_1 = arith.constant 0 : i32
    return %c0_i32, %c0_i32_0 : i32, i32
  }
  func.func @transform_7(%arg0: i32) -> (i32, i32) {
    %c0_i32 = arith.constant 0 : i32
    %c0_i32_0 = arith.constant 0 : i32
    %c0_i32_1 = arith.constant 0 : i32
    return %c0_i32, %c0_i32_0 : i32, i32
  }
  func.func @transform_8(%arg0: i32) -> (i32, i32) {
    %c0_i32 = arith.constant 0 : i32
    %c0_i32_0 = arith.constant 0 : i32
    %c0_i32_1 = arith.constant 0 : i32
    return %c0_i32, %c0_i32_0 : i32, i32
  }
  func.func @transform_9(%arg0: i32) -> (i32, i32) {
    %c0_i32 = arith.constant 0 : i32
    %c0_i32_0 = arith.constant 0 : i32
    %c0_i32_1 = arith.constant 0 : i32
    return %c0_i32, %c0_i32_0 : i32, i32
  }
  func.func @transform_10(%arg0: i32) -> (i32, i32, i32) {
    %c0_i32 = arith.constant 0 : i32
    %c0_i32_0 = arith.constant 0 : i32
    %c0_i32_1 = arith.constant 0 : i32
    return %arg0, %c0_i32, %c0_i32_0 : i32, i32, i32
  }
}

</mosaic_0001>

<bundles_post_ra>
// kernel: tile.33
= control target key start
LH: loop header
LB: loop body
LE: loop exit
PB: predicated region body
PF: predicated region fallthrough
CT: control target
= control target key end

     0   :  { %s28_s0 = inlined_call_operand.vmem [shape: f32[8], index: 0, kind: input, shape index: {}]   ;;  %s29_s1 = inlined_call_operand.vmem [shape: f32[14,8], index: 1, kind: output, shape index: {}]  }
   0x1   :  { %v4_v0 = vld [vmem:[%s28_s0] ss:$0 sm:$0xff] }
   0x2   :  { %5 = vst [vmem:[%s29_s1] sm:$0xff] %v4_v0 }
   0x3   :  { %8 = vst [vmem:[%s29_s1 + $0x8] sm:$0xff] %v4_v0 }

// kernel: tile.34
= control target key start
LH: loop header
LB: loop body
LE: loop exit
PB: predicated region body
PF: predicated region fallthrough
CT: control target
= control target key end

     0   :  { %s115_s10 = smov 104   ;;  %s116_s11 = smov 88   ;;  %vm3_vm0 = vcmask 64512   ;;  %vm9_vm1 = vcmask 917312   ;;  %vm15_vm2 = vcmask 851712   ;;  %vm21_vm3 = vcmask 786112   ;;  %s183_s0 = inlined_call_operand.vmem [shape: f32[14,8], index: 0, kind: input, shape index: {}]   ;;  %s184_s1 = inlined_call_operand.vmem [shape: f32[1,112], index: 1, kind: output, shape index: {}]  }
   0x1   :  { %v89_v0 = vld [vmem:[%s183_s0 + $0xd] sm:$0x1]   ;;  %v91_v1 = vld [vmem:[%s183_s0 + $0xb] sm:$0x1]   ;;  %v93_v2 = vld [vmem:[%s183_s0 + $0x9] sm:$0x1]  }
   0x2   :  { %7 = vrot.lane.b32.xlu0 %v89_v0, %s115_s10  ;;  %19 = vrot.lane.b32.xlu1 %v91_v1, %s116_s11  ;;  %s117_s14 = smov 72   ;;  %v90_v3 = vld [vmem:[%s183_s0 + $0xc] sm:$0x1]   ;;  %v92_v4 = vld [vmem:[%s183_s0 + $0xa] sm:$0x1]   ;;  %s118_s19 = smov 96  }
   0x3   :  { %31 = vrot.lane.b32.xlu2 %v93_v2, %s117_s14  ;;  %s119_s20 = smov 80   ;;  %v94_v5 = vld [vmem:[%s183_s0 + $0x8] sm:$0x1]   ;;  %s120_s23 = smov 64   ;;  %v95_v6 = vld [vmem:[%s183_s0 + $0x7] sm:$0x1]  }
   0x4   :  { %v96_v7 = vld [vmem:[%s183_s0 + $0x6] sm:$0x1]   ;;  %s121_s28 = smov 56   ;;  %s122_s29 = smov 48   ;;  %v97_v8 = vld [vmem:[%s183_s0 + $0x5] sm:$0x1]  }
   0x5   :  { %s123_s3 = smov 40   ;;  %v98_v9 = vld [vmem:[%s183_s0 + $0x4] sm:$0x1]   ;;  %v99_v10 = vld [vmem:[%s183_s0 + $0x3] sm:$0x1]   ;;  %s124_s8 = smov 32  }
   0x6   :  { %s125_s9 = smov 24   ;;  %v100_v11 = vld [vmem:[%s183_s0 + $0x2] sm:$0x1]   ;;  %s126_s12 = smov 16   ;;  %v101_v12 = vld [vmem:[%s183_s0 + $0x1] sm:$0x1]  }
   0x7   :  { %s127_s15 = smov 8   ;;  %v2_v13 = vld [vmem:[%s183_s0] sm:$0x1]   ;;  %vm27_vm4 = vcmask 720512   ;;  %vm33_vm5 = vcmask 654912   ;;  %vm39_vm6 = vcmask 589312  }
   0x8   :  { %4 = vst.msk [vmem:[#allocation0] sm:$0x1] %vm3_vm0, %v2_v13   ;;  %vm45_vm7 = vcmask 523712   ;;  %vm51_vm8 = vcmask 458112   ;;  %vm57_vm9 = vcmask 392512   ;;  %vm63_vm10 = vcmask 326912  }
   0x9   :  { %vm69_vm11 = vcmask 261312   ;;  %vm75_vm12 = vcmask 195712   ;;  %vm81_vm13 = vcmask 130112  }
   0xa   :  { %13 = vrot.lane.b32.xlu0 %v90_v3, %s118_s19  ;;  %25 = vrot.lane.b32.xlu1 %v92_v4, %s119_s20 }
   0xb   :  { %37 = vrot.lane.b32.xlu2 %v94_v5, %s120_s23 }
  0x12   :  { %43 = vrot.lane.b32.xlu0 %v95_v6, %s121_s28  ;;  %49 = vrot.lane.b32.xlu1 %v96_v7, %s122_s29 }
  0x13   :  { %55 = vrot.lane.b32.xlu2 %v97_v8, %s123_s3 }
  0x1a   :  { %61 = vrot.lane.b32.xlu0 %v98_v9, %s124_s8  ;;  %67 = vrot.lane.b32.xlu1 %v99_v10, %s125_s9 }
  0x1b   :  { %73 = vrot.lane.b32.xlu2 %v100_v11, %s126_s12 }
  0x22   :  { %79 = vrot.lane.b32.xlu0 %v101_v12, %s127_s15 }
  0x5d   :  { %v32_v14 = vpop.permute.xlu2 %31  }
  0x65   :  { %v38_v15 = vpop.permute.xlu2 %37  }
  0x6d   :  { %v56_v16 = vpop.permute.xlu2 %55  }
  0x74   :  { %v8_v17 = vpop.permute.xlu0 %7   ;;  %v20_v18 = vpop.permute.xlu1 %19  }
  0x75   :  { %10 = vst.msk [vmem:[#allocation0] sm:$0x1] %vm9_vm1, %v8_v17   ;;  %v74_v19 = vpop.permute.xlu2 %73  }
  0x7c   :  { %v14_v20 = vpop.permute.xlu0 %13   ;;  %v26_v21 = vpop.permute.xlu1 %25  }
  0x7d   :  { %16 = vst.msk [vmem:[#allocation0] sm:$0x1] %vm15_vm2, %v14_v20  }
  0x7e   :  { %22 = vst.msk [vmem:[#allocation0] sm:$0x1] %vm21_vm3, %v20_v18  }
  0x7f   :  { %28 = vst.msk [vmem:[#allocation0] sm:$0x1] %vm27_vm4, %v26_v21  }
  0x80   :  { %34 = vst.msk [vmem:[#allocation0] sm:$0x1] %vm33_vm5, %v32_v14  }
  0x81   :  { %40 = vst.msk [vmem:[#allocation0] sm:$0x1] %vm39_vm6, %v38_v15  }
  0x84   :  { %v44_v22 = vpop.permute.xlu0 %43   ;;  %v50_v23 = vpop.permute.xlu1 %49  }
  0x85   :  { %46 = vst.msk [vmem:[#allocation0] sm:$0x1] %vm45_vm7, %v44_v22  }
  0x86   :  { %52 = vst.msk [vmem:[#allocation0] sm:$0x1] %vm51_vm8, %v50_v23  }
  0x87   :  { %58 = vst.msk [vmem:[#allocation0] sm:$0x1] %vm57_vm9, %v56_v16  }
  0x8c   :  { %v62_v24 = vpop.permute.xlu0 %61   ;;  %v68_v25 = vpop.permute.xlu1 %67  }
  0x8d   :  { %64 = vst.msk [vmem:[#allocation0] sm:$0x1] %vm63_vm10, %v62_v24  }
  0x8e   :  { %70 = vst.msk [vmem:[#allocation0] sm:$0x1] %vm69_vm11, %v68_v25  }
  0x8f   :  { %76 = vst.msk [vmem:[#allocation0] sm:$0x1] %vm75_vm12, %v74_v19  }
  0x94   :  { %v80_v26 = vpop.permute.xlu0 %79  }
  0x95   :  { %82 = vst.msk [vmem:[#allocation0] sm:$0x1] %vm81_vm13, %v80_v26  }
  0x9c   :  { %v85_v27 = vld [vmem:[#allocation0] sm:$0x1] }
  0x9d   :  { %88 = vst [vmem:[%s184_s1] sm:$0x1] %v85_v27 }

// kernel: tile.43
= control target key start
LH: loop header
LB: loop body
LE: loop exit
PB: predicated region body
PF: predicated region fallthrough
CT: control target
= control target key end

     0   :  { %s28_s0 = inlined_call_operand.vmem [shape: f32[8], index: 0, kind: input, shape index: {}]   ;;  %s29_s1 = inlined_call_operand.vmem [shape: f32[12,8], index: 1, kind: output, shape index: {}]  }
   0x1   :  { %v4_v0 = vld [vmem:[%s28_s0] ss:$0 sm:$0xff] }
   0x2   :  { %5 = vst [vmem:[%s29_s1] sm:$0xff] %v4_v0 }
   0x3   :  { %8 = vst [vmem:[%s29_s1 + $0x8] sm:$0xff] %v4_v0 }

// kernel: tile.44
= control target key start
LH: loop header
LB: loop body
LE: loop exit
PB: predicated region body
PF: predicated region fallthrough
CT: control target
= control target key end

     0   :  { %s99_s10 = smov 88   ;;  %s100_s11 = smov 72   ;;  %vm3_vm0 = vcmask 64512   ;;  %vm9_vm1 = vcmask 786112   ;;  %vm15_vm2 = vcmask 720512   ;;  %vm21_vm3 = vcmask 654912   ;;  %s159_s0 = inlined_call_operand.vmem [shape: f32[12,8], index: 0, kind: input, shape index: {}]   ;;  %s160_s1 = inlined_call_operand.vmem [shape: f32[1,96], index: 1, kind: output, shape index: {}]  }
   0x1   :  { %v77_v0 = vld [vmem:[%s159_s0 + $0xb] sm:$0x1]   ;;  %v79_v1 = vld [vmem:[%s159_s0 + $0x9] sm:$0x1]   ;;  %v81_v2 = vld [vmem:[%s159_s0 + $0x7] sm:$0x1]  }
   0x2   :  { %7 = vrot.lane.b32.xlu0 %v77_v0, %s99_s10  ;;  %19 = vrot.lane.b32.xlu1 %v79_v1, %s100_s11  ;;  %s101_s14 = smov 56   ;;  %v78_v3 = vld [vmem:[%s159_s0 + $0xa] sm:$0x1]   ;;  %v80_v4 = vld [vmem:[%s159_s0 + $0x8] sm:$0x1]   ;;  %s102_s19 = smov 80  }
   0x3   :  { %31 = vrot.lane.b32.xlu2 %v81_v2, %s101_s14  ;;  %s103_s20 = smov 64   ;;  %v82_v5 = vld [vmem:[%s159_s0 + $0x6] sm:$0x1]   ;;  %s104_s23 = smov 48   ;;  %v83_v6 = vld [vmem:[%s159_s0 + $0x5] sm:$0x1]  }
   0x4   :  { %v84_v7 = vld [vmem:[%s159_s0 + $0x4] sm:$0x1]   ;;  %s105_s28 = smov 40   ;;  %s106_s29 = smov 32   ;;  %v85_v8 = vld [vmem:[%s159_s0 + $0x3] sm:$0x1]  }
   0x5   :  { %s107_s3 = smov 24   ;;  %v86_v9 = vld [vmem:[%s159_s0 + $0x2] sm:$0x1]   ;;  %v87_v10 = vld [vmem:[%s159_s0 + $0x1] sm:$0x1]   ;;  %s108_s8 = smov 16  }
   0x6   :  { %s109_s9 = smov 8   ;;  %v2_v11 = vld [vmem:[%s159_s0] sm:$0x1]   ;;  %vm27_vm4 = vcmask 589312   ;;  %vm33_vm5 = vcmask 523712   ;;  %vm39_vm6 = vcmask 458112  }
   0x7   :  { %4 = vst.msk [vmem:[#allocation0] sm:$0x1] %vm3_vm0, %v2_v11   ;;  %vm45_vm7 = vcmask 392512   ;;  %vm51_vm8 = vcmask 326912   ;;  %vm57_vm9 = vcmask 261312   ;;  %vm63_vm10 = vcmask 195712  }
   0x8   :  { %vm69_vm11 = vcmask 130112  }
   0xa   :  { %13 = vrot.lane.b32.xlu0 %v78_v3, %s102_s19  ;;  %25 = vrot.lane.b32.xlu1 %v80_v4, %s103_s20 }
   0xb   :  { %37 = vrot.lane.b32.xlu2 %v82_v5, %s104_s23 }
  0x12   :  { %43 = vrot.lane.b32.xlu0 %v83_v6, %s105_s28  ;;  %49 = vrot.lane.b32.xlu1 %v84_v7, %s106_s29 }
  0x13   :  { %55 = vrot.lane.b32.xlu2 %v85_v8, %s107_s3 }
  0x1a   :  { %61 = vrot.lane.b32.xlu0 %v86_v9, %s108_s8  ;;  %67 = vrot.lane.b32.xlu1 %v87_v10, %s109_s9 }
  0x5d   :  { %v32_v12 = vpop.permute.xlu2 %31  }
  0x65   :  { %v38_v13 = vpop.permute.xlu2 %37  }
  0x6d   :  { %v56_v14 = vpop.permute.xlu2 %55  }
  0x74   :  { %v8_v15 = vpop.permute.xlu0 %7   ;;  %v20_v16 = vpop.permute.xlu1 %19  }
  0x75   :  { %10 = vst.msk [vmem:[#allocation0] sm:$0x1] %vm9_vm1, %v8_v15  }
  0x7c   :  { %v14_v17 = vpop.permute.xlu0 %13   ;;  %v26_v18 = vpop.permute.xlu1 %25  }
  0x7d   :  { %16 = vst.msk [vmem:[#allocation0] sm:$0x1] %vm15_vm2, %v14_v17  }
  0x7e   :  { %22 = vst.msk [vmem:[#allocation0] sm:$0x1] %vm21_vm3, %v20_v16  }
  0x7f   :  { %28 = vst.msk [vmem:[#allocation0] sm:$0x1] %vm27_vm4, %v26_v18  }
  0x80   :  { %34 = vst.msk [vmem:[#allocation0] sm:$0x1] %vm33_vm5, %v32_v12  }
  0x81   :  { %40 = vst.msk [vmem:[#allocation0] sm:$0x1] %vm39_vm6, %v38_v13  }
  0x84   :  { %v44_v19 = vpop.permute.xlu0 %43   ;;  %v50_v20 = vpop.permute.xlu1 %49  }
  0x85   :  { %46 = vst.msk [vmem:[#allocation0] sm:$0x1] %vm45_vm7, %v44_v19  }
  0x86   :  { %52 = vst.msk [vmem:[#allocation0] sm:$0x1] %vm51_vm8, %v50_v20  }
  0x87   :  { %58 = vst.msk [vmem:[#allocation0] sm:$0x1] %vm57_vm9, %v56_v14  }
  0x8c   :  { %v62_v21 = vpop.permute.xlu0 %61   ;;  %v68_v22 = vpop.permute.xlu1 %67  }
  0x8d   :  { %64 = vst.msk [vmem:[#allocation0] sm:$0x1] %vm63_vm10, %v62_v21  }
  0x8e   :  { %70 = vst.msk [vmem:[#allocation0] sm:$0x1] %vm69_vm11, %v68_v22  }
  0x95   :  { %v73_v23 = vld [vmem:[#allocation0] sm:$0x1] }
  0x96   :  { %76 = vst [vmem:[%s160_s1] sm:$0x1] %v73_v23 }

// kernel: crop_res_block.1
= control target key start
LH: loop header
LB: loop body
LE: loop exit
PB: predicated region body
PF: predicated region fallthrough
CT: control target
= control target key end

     0   :  { %s1053_s13 = smov 0   ;;  %s1281_s0 = inlined_call_operand.vmem [shape: bf16[2,16,64], index: 0, kind: input, shape index: {}]   ;;  %s1282_s1 = inlined_call_operand.vmem [shape: bf16[3,64,112], index: 1, kind: input, shape index: {}]   ;;  %s1283_s2 = inlined_call_operand.vmem [shape: f32[1,112], index: 2, kind: input, shape index: {}]   ;;  %s1284_s3 = inlined_call_operand.vmem [shape: f32[1,112], index: 3, kind: input, shape index: {}]   ;;  %s1285_s4 = inlined_call_operand.vmem [shape: f32[3,112,96], index: 4, kind: input, shape index: {}]   ;;  %s1286_s5 = inlined_call_operand.vmem [shape: f32[1,96], index: 5, kind: input, shape index: {}]   ;;  %s1287_s6 = inlined_call_operand.vmem [shape: f32[1,96], index: 6, kind: input, shape index: {}]   ;;  %s1288_s7 = inlined_call_operand.vmem [shape: bf16[64,96], index: 7, kind: input, shape index: {}]   ;;  %s1289_s8 = inlined_call_operand.vmem [shape: f32[1,96], index: 8, kind: input, shape index: {}]   ;;  %s1290_s9 = inlined_call_operand.vmem [shape: f32[1,96], index: 9, kind: input, shape index: {}]   ;;  %s1291_s10 = inlined_call_operand.vmem [shape: f32[2,12,96], index: 10, kind: output, shape index: {}]  }
   0x1 LB: > { %s824_s14 = sadd.s32 4294967295, %s996_s13   ;;  %p828_p0 = scmp.ge.s32.totalorder %s996_s13, 1  ;;  %s996_s13 = sphi %s1053_s13, %s20_s13  }
   0x2   : > { %p312_p1 = scmp.lt.s32.totalorder %s996_s13, 3 }
   0x4   : > { %p313_p2 = pnand %p828_p0, %p312_p1 }
   0x5   : > { %p350_p3 = scmp.lt.s32.totalorder (!%p313_p2), %s824_s14, 1 }
   0x6   : > { %316 = sbr.rel (%p313_p2) target bundleno = 332 (0x14c), region = 60 }
   0xb   : > { %v967_v0 = vld [vmem:[%s1282_s1 + $0x38] sm:$0xff]  ;;  %v966_v3 = vld [vmem:[%s1282_s1 + $0x30] sm:$0xff]  ;;  %s1293_s14 = smov (!%p350_p3, %s824_s14), 1  ;;  %v965_v6 = vld [vmem:[%s1282_s1 + $0x28] sm:$0xff]  ;;  %vm400_vm0 = vcmask 523264   ;;  %vm514_vm1 = vcmask 1046528  }
   0xc   : > { %v971_v1 = vld [vmem:[%s1282_s1 + $0x58] sm:$0xff]  ;;  %455 = vmatpush.bf16.msra.mxu1 %v967_v0  ;;  %v970_v4 = vld [vmem:[%s1282_s1 + $0x50] sm:$0xff]  ;;  %v559_v7 = vld [vmem:[%s1285_s4 + $0x68] sm:$0xff]  ;;  %s957_s17 = sshll.u32 %s1293_s14, 3  ;;  %vm524_vm2 = vcmask 1045504   ;;  %vm560_vm3 = vcmask 916480  }
   0xd   : > { %v963_v2 = vld [vmem:[%s1282_s1 + $0x18] sm:$0xff]  ;;  %502 = vmatpush.bf16.msra.mxu2 %v971_v1  ;;  %v962_v5 = vld [vmem:[%s1282_s1 + $0x10] sm:$0xff]  ;;  %569 = vmatpush.msra.mxu3 %v559_v7  ;;  %v969_v8 = vld [vmem:[%s1282_s1 + $0x48] sm:$0xff]  ;;  %s354_s24 = scalar_lea.vmem %s1281_s0, %s957_s17  ;;  %s958_s21 = sshll.u32 %s1293_s14, 4  ;;  %vm765_vm4 = vcmask 785408   ;;  %vm767_vm5 = vcmask 781312  }
   0xe   : > { %408 = vmatpush.bf16.msra.mxu0 %v963_v2  ;;  %v961_v9 = vld [vmem:[%s1282_s1 + $0x8] sm:$0xff]  ;;  %v964_v10 = vld [vmem:[%s1282_s1 + $0x20] sm:$0xff]  ;;  %v919_v15 = vld [vmem:[%s1285_s4 + $0xd8] sm:$0xff] }
   0xf   : > { %v968_v11 = vld [vmem:[%s1282_s1 + $0x40] sm:$0xff]  ;;  %v935_v13 = vld [vmem:[%s1285_s4 + $0x148] sm:$0xff]  ;;  %v918_v17 = vld [vmem:[%s1285_s4 + $0xd0] sm:$0xff] }
  0x10   : > { %456 = vmatpush.bf16.msra.mxu1 %v966_v3  ;;  %v960_v12 = vld [vmem:[%s1282_s1] sm:$0xff]  ;;  %v557_v19 = vld [vmem:[%s1285_s4 + $0x58] sm:$0xff]  ;;  %v917_v20 = vld [vmem:[%s1285_s4 + $0xc8] sm:$0xff] }
  0x11   : > { %503 = vmatpush.bf16.msra.mxu2 %v970_v4  ;;  %v1109_v14 = vld [vmem:[%s354_s24] sm:$0xff]  ;;  %v933_v21 = vld [vmem:[%s1285_s4 + $0x138] sm:$0xff]  ;;  %v556_v23 = vld [vmem:[%s1285_s4 + $0x50] sm:$0xff]  ;;  %s359_s24 = scalar_lea.vmem %s1291_s10, %s958_s21 }
  0x12   : > { %409 = vmatpush.bf16.msra.mxu0 %v962_v5  ;;  %v558_v16 = vld [vmem:[%s1285_s4 + $0x60] sm:$0xff]  ;;  %v975_v22 = vld [vmem:[%s1288_s7 + $0x18] sm:$0xff]  ;;  %v932_v25 = vld [vmem:[%s1285_s4 + $0x130] sm:$0xff] }
  0x13   : > { %v934_v18 = vld [vmem:[%s1285_s4 + $0x140] sm:$0xff]  ;;  %570 = vmatpush.msra.mxu3 %v558_v16  ;;  %v555_v26 = vld [vmem:[%s1285_s4 + $0x48] sm:$0xff]  ;;  %v915_v27 = vld [vmem:[%s1285_s4 + $0xb8] sm:$0xff] }
  0x14   : > { %457 = vmatpush.bf16.msra.mxu1 %v965_v6  ;;  %v916_v24 = vld [vmem:[%s1285_s4 + $0xc0] sm:$0xff]  ;;  %v931_v28 = vld [vmem:[%s1285_s4 + $0x128] sm:$0xff]  ;;  %v974_v29 = vld [vmem:[%s1288_s7 + $0x10] sm:$0xff] }
  0x15   : > { %504 = vmatpush.bf16.msra.mxu2 %v969_v8  ;;  %571 = vmatpush.msra.mxu3 %v557_v19  ;;  %v554_v30 = vld [vmem:[%s1285_s4 + $0x40] sm:$0xff]  ;;  %v914_v31 = vld [vmem:[%s1285_s4 + $0xb0] sm:$0xff]  ;;  %v553_v33 = vld [vmem:[%s1285_s4 + $0x38] sm:$0xff] }
  0x16   : > { %410 = vmatpush.bf16.msra.mxu0 %v961_v9  ;;  %v930_v32 = vld [vmem:[%s1285_s4 + $0x120] sm:$0xff]  ;;  %v913_v34 = vld [vmem:[%s1285_s4 + $0xa8] sm:$0xff]  ;;  %v929_v35 = vld [vmem:[%s1285_s4 + $0x118] sm:$0xff] }
  0x17   : > { %572 = vmatpush.msra.mxu3 %v556_v23  ;;  %v973_v36 = vld [vmem:[%s1288_s7 + $0x8] sm:$0xff]  ;;  %v552_v37 = vld [vmem:[%s1285_s4 + $0x30] sm:$0xff]  ;;  %v912_v38 = vld [vmem:[%s1285_s4 + $0xa0] sm:$0xff] }
  0x18   : > { %458 = vmatpush.bf16.msra.mxu1 %v964_v10  ;;  %v928_v39 = vld [vmem:[%s1285_s4 + $0x110] sm:$0xff]  ;;  %v551_v40 = vld [vmem:[%s1285_s4 + $0x28] sm:$0xff]  ;;  %v911_v41 = vld [vmem:[%s1285_s4 + $0x98] sm:$0xff] }
  0x19   : > { %505 = vmatpush.bf16.msra.mxu2 %v968_v11  ;;  %573 = vmatpush.msra.mxu3 %v555_v26  ;;  %v927_v42 = vld [vmem:[%s1285_s4 + $0x108] sm:$0xff]  ;;  %v972_v43 = vld [vmem:[%s1288_s7] sm:$0xff]  ;;  %v910_v45 = vld [vmem:[%s1285_s4 + $0x90] sm:$0xff] }
  0x1a   : > { %411 = vmatpush.bf16.msra.mxu0 %v960_v12  ;;  %v550_v44 = vld [vmem:[%s1285_s4 + $0x20] sm:$0xff]  ;;  %v549_v47 = vld [vmem:[%s1285_s4 + $0x18] sm:$0xff]  ;;  %v909_v48 = vld [vmem:[%s1285_s4 + $0x88] sm:$0xff] }
  0x1b   : > { %878 = vmatmul.msk.bf16.vlgmr.msra.gmra.mxu1 %vm400_vm0, %v1109_v14  ;;  %574 = vmatpush.msra.mxu3 %v554_v30  ;;  %v926_v46 = vld [vmem:[%s1285_s4 + $0x100] sm:$0xff]  ;;  %v925_v49 = vld [vmem:[%s1285_s4 + $0xf8] sm:$0xff]  ;;  %v548_v50 = vld [vmem:[%s1285_s4 + $0x10] sm:$0xff] }
  0x1c   : > { %645 = vmatpush.msrb.mxu1 %v935_v13  ;;  %903 = vmatmul.msk.bf16.vlgmr.msra.gmra.mxu2 %vm400_vm0, %v1109_v14  ;;  %v908_v51 = vld [vmem:[%s1285_s4 + $0x80] sm:$0xff]  ;;  %v924_v52 = vld [vmem:[%s1285_s4 + $0xf0] sm:$0xff]  ;;  %v547_v53 = vld [vmem:[%s1285_s4 + $0x8] sm:$0xff] }
  0x1d   : > { %853 = vmatmul.msk.bf16.vlgmr.msra.gmra.mxu0 %vm400_vm0, %v1109_v14  ;;  %732 = vmatpush.bf16.msrb.mxu2 %v975_v22  ;;  %v907_v54 = vld [vmem:[%s1285_s4 + $0x78] sm:$0xff]  ;;  %v923_v55 = vld [vmem:[%s1285_s4 + $0xe8] sm:$0xff]  ;;  %v546_v56 = vld [vmem:[%s1285_s4] sm:$0xff] }
  0x1e   : > { %607 = vmatpush.msrb.mxu0 %v919_v15  ;;  %646 = vmatpush.msrb.mxu1 %v934_v18  ;;  %v906_v57 = vld [vmem:[%s1285_s4 + $0x70] sm:$0xff]  ;;  %v922_v58 = vld [vmem:[%s1285_s4 + $0xe0] sm:$0xff] }
  0x1f   : > { %575 = vmatpush.msra.mxu3 %v553_v33  ;;  %v984_v7 = vld [vmem:[%s1283_s2] ss:$0 sm:$0xff] }
  0x20   : > { %608 = vmatpush.msrb.mxu0 %v918_v17  ;;  %647 = vmatpush.msrb.mxu1 %v933_v21  ;;  %v985_v11 = vld [vmem:[%s1284_s3] ss:$0 sm:$0xff] }
  0x21   : > { %733 = vmatpush.bf16.msrb.mxu2 %v974_v29  ;;  %576 = vmatpush.msra.mxu3 %v552_v37  ;;  %v986_v22 = vld [vmem:[%s1289_s8] ss:$0 sm:$0xff] }
  0x22   : > { %609 = vmatpush.msrb.mxu0 %v917_v20  ;;  %648 = vmatpush.msrb.mxu1 %v932_v25  ;;  %v987_v26 = vld [vmem:[%s1290_s9] ss:$0 sm:$0xff] }
  0x23   : > { %577 = vmatpush.msra.mxu3 %v551_v40 }
  0x24   : > { %610 = vmatpush.msrb.mxu0 %v916_v24  ;;  %649 = vmatpush.msrb.mxu1 %v931_v28 }
  0x25   : > { %734 = vmatpush.bf16.msrb.mxu2 %v973_v36  ;;  %578 = vmatpush.msra.mxu3 %v550_v44 }
  0x26   : > { %611 = vmatpush.msrb.mxu0 %v915_v27  ;;  %650 = vmatpush.msrb.mxu1 %v930_v32 }
  0x27   : > { %579 = vmatpush.msra.mxu3 %v549_v47 }
  0x28   : > { %612 = vmatpush.msrb.mxu0 %v914_v31  ;;  %651 = vmatpush.msrb.mxu1 %v929_v35 }
  0x29   : > { %735 = vmatpush.bf16.msrb.mxu2 %v972_v43  ;;  %580 = vmatpush.msra.mxu3 %v548_v50 }
  0x2a   : > { %613 = vmatpush.msrb.mxu0 %v913_v34  ;;  %652 = vmatpush.msrb.mxu1 %v928_v39 }
  0x2b   : > { %581 = vmatpush.msra.mxu3 %v547_v53 }
  0x2c   : > { %614 = vmatpush.msrb.mxu0 %v912_v38  ;;  %653 = vmatpush.msrb.mxu1 %v927_v42  ;;  %v988_v38 = vld [vmem:[%s1286_s5] ss:$0 sm:$0xff] }
  0x2d   : > { %954 = vmatmul.msk.bf16.vlgmr.msrb.gmra.mxu2 %vm400_vm0, %v1109_v14  ;;  %582 = vmatpush.msra.mxu3 %v546_v56  ;;  %v989_v42 = vld [vmem:[%s1287_s6] ss:$0 sm:$0xff] }
  0x2e   : > { %615 = vmatpush.msrb.mxu0 %v911_v41  ;;  %654 = vmatpush.msrb.mxu1 %v926_v46 }
  0x30   : > { %616 = vmatpush.msrb.mxu0 %v910_v45  ;;  %655 = vmatpush.msrb.mxu1 %v925_v49 }
  0x32   : > { %617 = vmatpush.msrb.mxu0 %v909_v48  ;;  %656 = vmatpush.msrb.mxu1 %v924_v52 }
  0x34   : > { %618 = vmatpush.msrb.mxu0 %v908_v51  ;;  %657 = vmatpush.msrb.mxu1 %v923_v55 }
  0x36   : > { %619 = vmatpush.msrb.mxu0 %v907_v54  ;;  %658 = vmatpush.msrb.mxu1 %v922_v58 }
  0x38   : > { %620 = vmatpush.msrb.mxu0 %v906_v57 }
  0x98   : > { %v460_v59 = vpop.f32.mrf.mxu1 }
  0x99   : > { %v515_v0 = vrot.slane %v460_v59, 1 }
  0x9a   : > { %v413_v60 = vpop.f32.mrf.mxu0 }
  0x9f   : > { %v507_v61 = vpop.f32.mrf.mxu2 }
  0xa0   : > { %v462_v62 = vpop.f32.mrf.mxu1  ;;  %v525_v3 = vrot.slane %v507_v61, 2 }
  0xa1   : > { %v516_v63 = vrot.slane %v462_v62, 1 }
  0xa2   : > { %v415_v4 = vpop.f32.mrf.mxu0 }
  0xa3   : > { %v517_v1 = vsel %vm514_vm1, %v515_v0, %v516_v63  ;;  %v521_v9 = vadd.f32 %v516_v63, %v415_v4 }
  0xa4   : > { %v520_v6 = vadd.f32 %v517_v1, %v413_v60 }
  0xa7   : > { %v509_v2 = vpop.f32.mrf.mxu2 }
  0xa8   : > { %v526_v5 = vrot.slane %v509_v2, 2 }
  0xaa   : > { %v527_v8 = vsel %vm524_vm2, %v525_v3, %v526_v5  ;;  %v531_v12 = vadd.f32 %v526_v5, %v521_v9 }
  0xab   : > { %v530_v10 = vadd.f32 %v527_v8, %v520_v6 }
  0xac   : > { %v537_v15 = vmul.f32 %v984_v7, %v531_v12 }
  0xad   : > { %v536_v13 = vmul.f32 %v984_v7, %v530_v10 }
  0xae   : > { %v543_v17 = vadd.f32 %v985_v11, %v537_v15 }
  0xaf   : > { %v542_v14 = vadd.f32 %v985_v11, %v536_v13 }
  0xb0   : > { %v545_v18 = vmax.f32 %v543_v17, 0.0  ;;  %v737_v19 = vpop.f32.mrf.mxu2 }
  0xb1   : > { %v544_v16 = vmax.f32 %v542_v14, 0.0  ;;  %v746_v25 = vmul.f32 %v986_v22, %v737_v19 }
  0xb3   : > { %904 = vmatmul.msk.f32.vlgmr.msra.gmra.mxu3 %vm560_vm3, %v544_v16  ;;  %920 = vmatmul.msk.f32.vlgmr.msrb.gmra.mxu0 %vm560_vm3, %v544_v16  ;;  %v752_v33 = vadd.f32 %v987_v26, %v746_v25 }
  0xb4   : > { %936 = vmatmul.msk.f32.vlgmr.msrb.gmra.mxu1 %vm560_vm3, %v544_v16 }
  0xb5   : > { %v756_v43 = vrot.slane %v752_v33, 2 }
  0xb8   : > { %v739_v23 = vpop.f32.mrf.mxu2 }
  0xb9   : > { %v747_v27 = vmul.f32 %v986_v22, %v739_v23 }
  0xbb   : > { %905 = vmatmul.msk.f32.gmra.mxu3 %vm560_vm3, %v545_v18  ;;  %921 = vmatmul.msk.f32.gmra.mxu0 %vm560_vm3, %v545_v18  ;;  %v753_v35 = vadd.f32 %v987_v26, %v747_v27 }
  0xbc   : > { %937 = vmatmul.msk.f32.gmra.mxu1 %vm560_vm3, %v545_v18 }
  0xbd   : > { %v757_v44 = vrot.slane %v753_v35, 2 }
  0xbf   : > { %v758_v49 = vsel %vm524_vm2, %v756_v43, %v757_v44 }
 0x130   : > { %v622_v20 = vpop.f32.mrf.mxu0 }
 0x131   : > { %v660_v21 = vpop.f32.mrf.mxu1  ;;  %v668_v29 = vrot.slane %v622_v20, 1 }
 0x132   : > { %v677_v34 = vrot.slane %v660_v21, 2 }
 0x136   : > { %v584_v24 = vpop.f32.mrf.mxu3 }
 0x138   : > { %v625_v28 = vpop.f32.mrf.mxu0 }
 0x139   : > { %v669_v30 = vrot.slane %v625_v28, 1  ;;  %v663_v31 = vpop.f32.mrf.mxu1 }
 0x13a   : > { %v678_v32 = vrot.slane %v663_v31, 2 }
 0x13b   : > { %v670_v36 = vsel %vm514_vm1, %v668_v29, %v669_v30 }
 0x13c   : > { %v673_v37 = vadd.f32 %v670_v36, %v584_v24  ;;  %v679_v39 = vsel %vm524_vm2, %v677_v34, %v678_v32 }
 0x13e   : > { %v682_v40 = vadd.f32 %v679_v39, %v673_v37  ;;  %v587_v41 = vpop.f32.mrf.mxu3 }
 0x13f   : > { %v674_v45 = vadd.f32 %v669_v30, %v587_v41 }
 0x140   : > { %v688_v46 = vmul.f32 %v988_v38, %v682_v40 }
 0x141   : > { %v683_v47 = vadd.f32 %v678_v32, %v674_v45 }
 0x142   : > { %v694_v48 = vadd.f32 %v989_v42, %v688_v46 }
 0x143   : > { %v689_v50 = vmul.f32 %v988_v38, %v683_v47 }
 0x144   : > { %v761_v51 = vadd.f32 %v758_v49, %v694_v48 }
 0x145   : > { %v695_v52 = vadd.f32 %v989_v42, %v689_v50 }
 0x146   : > { %v763_v53 = vmax.f32 %v761_v51, 0.0 }
 0x147   : > { %v762_v54 = vadd.f32 %v757_v44, %v695_v52 }
 0x148   : > { %766 = vst.msk [vmem:[%s359_s24] sm:$0xff] %vm765_vm4, %v763_v53 }
 0x149   : > { %v764_v55 = vmax.f32 %v762_v54, 0.0 }
 0x14b   : > { %768 = vst.msk [vmem:[%s359_s24 + $0x8] sm:$0xf] %vm767_vm5, %v764_v55 }
 0x14c PF: > { %s20_s13 = sadd.s32 1, %s996_s13  }
 0x14d   : > { %p17_p4 = scmp.ge.s32.totalorder %s20_s13, 4  }
 0x14f   :  { %19 = sbr.rel (!%p17_p4) target bundleno = 1 (0x1), region = 94 }

</bundles_post_ra>
